<compile_context>
chip_gen: v7x
topology: tpu7x:2x2x1
jax: 0.10.0
libtpu: 0.0.40
codegen_flags: <defaults>
</compile_context>

<pallas_src>
import functools

import jax
import jax.numpy as jnp
from jax.experimental import pallas as pl
from jax.experimental.pallas import tpu as pltpu

LANE = 128  # TPU lane width


def _conv_gemm_kernel(cols_ref, w_ref, o_ref):
    """One grid step = one tile of im2col rows (pixels across images/branches).

    cols_ref : [tile_m, K]      im2col patch rows (K = 9*C_in), bf16
    w_ref    : [K, C_out_pad]   shared conv weight as GEMM rhs, bf16,
                                lane-padded so C_out_pad % 128 == 0
    o_ref    : [tile_m, C_out_pad]  lane-dense output tile (f32)
    """
    o_ref[...] = jnp.dot(
        cols_ref[...], w_ref[...], preferred_element_type=jnp.float32
    ).astype(o_ref.dtype)


def conv3x3_shared(x_stack_nchw, weight_oihw, *, tile_m=256,
                   compute_dtype=jnp.bfloat16):
    """Shared-weight 3x3 same-padding conv over a stack of images.

    x_stack_nchw : [N, C_in, H, W]   (N = num_parallel_branches * batch)
    weight_oihw  : [C_out, C_in, 3, 3]
    returns      : [N, C_out, H, W]
    """
    N, C_in, H, W = x_stack_nchw.shape
    C_out = weight_oihw.shape[0]
    K = 9 * C_in

    # Lane-dense output width (full 128-lane stores instead of masked stores).
    c_out_pad = pl.cdiv(C_out, LANE) * LANE

    # ---- wrapper-side layout prep (pure XLA) --------------------------------
    # NCHW -> NHWC, 1-pixel spatial halo (SAME padding for k=3).
    x_nhwc = jnp.transpose(x_stack_nchw, (0, 2, 3, 1))
    x_pad = jnp.pad(x_nhwc, ((0, 0), (1, 1), (1, 1), (0, 0)))

    # im2col: (N, H, W, 9, C_in) -> (N*H*W, 9*C_in), K ordered (ky, kx, c).
    cols = jnp.stack(
        [x_pad[:, ky:ky + H, kx:kx + W, :] for ky in range(3) for kx in range(3)],
        axis=3,
    ).reshape(N * H * W, K)

    # Weight: [C_out, C_in, 3, 3] -> [(ky, kx, c), C_out] -> pad lanes.
    w = jnp.transpose(weight_oihw, (2, 3, 1, 0)).reshape(K, C_out)
    w = jnp.pad(w, ((0, 0), (0, c_out_pad - C_out)))

    # Pad the pixel (M) axis up to a multiple of tile_m so the grid is exact.
    M = N * H * W
    m_pad = pl.cdiv(M, tile_m) * tile_m
    cols = jnp.pad(cols, ((0, m_pad - M), (0, 0)))

    # bf16 feeds to the MXU; accumulation stays f32 inside the kernel.
    cols = cols.astype(compute_dtype)
    w = w.astype(compute_dtype)

    # ---- Pallas GEMM --------------------------------------------------------
    out = pl.pallas_call(
        _conv_gemm_kernel,
        out_shape=jax.ShapeDtypeStruct((m_pad, c_out_pad), x_stack_nchw.dtype),
        grid_spec=pltpu.PrefetchScalarGridSpec(
            num_scalar_prefetch=0,
            grid=(m_pad // tile_m,),
            in_specs=[
                pl.BlockSpec((tile_m, K), lambda m: (m, 0)),
                pl.BlockSpec((K, c_out_pad), lambda m: (0, 0)),  # shared weight
            ],
            out_specs=pl.BlockSpec((tile_m, c_out_pad), lambda m: (m, 0)),
        ),
        compiler_params=pltpu.CompilerParams(
            dimension_semantics=("parallel",),
            vmem_limit_bytes=48 * 1024 * 1024,
        ),
    )(cols, w)

    # Drop lane/row padding, back to NCHW for the PyTorch-style interface.
    out = out[:M, :C_out].reshape(N, H, W, C_out)
    return jnp.transpose(out, (0, 3, 1, 2))


def module_parallel_forward(x_parallel, weight_oihw, **kwargs):
    """Exact ModuleParallel semantics: list-in, list-out, shared module params.

    x_parallel : list of [B, C_in, H, W] arrays
    returns    : list of [B, C_out, H, W] arrays
    """
    P = len(x_parallel)
    B = x_parallel[0].shape[0]
    # Fuse the parallel list + batch into one pixel-row GEMM so a single
    # pallas_call covers [module(x) for x in x_parallel] with shared weights.
    stacked = jnp.concatenate(x_parallel, axis=0)          # [P*B, C_in, H, W]
    out = conv3x3_shared(stacked, weight_oihw, **kwargs)   # [P*B, C_out, H, W]
    return [out[i * B:(i + 1) * B] for i in range(P)]


if __name__ == "__main__":
    key = jax.random.PRNGKey(0)
    k_w, k_x0, k_x1 = jax.random.split(key, 3)

    B, C_in, H, W = 2, 4, 16, 16
    C_out = 8
    num_parallel = 2

    weight = jax.random.normal(k_w, (C_out, C_in, 3, 3), dtype=jnp.float32) * 0.1
    x_parallel = [
        jax.random.normal(k_x0, (B, C_in, H, W), dtype=jnp.float32),
        jax.random.normal(k_x1, (B, C_in, H, W), dtype=jnp.float32),
    ]

    outs = module_parallel_forward(x_parallel, weight)
    outs = [jax.block_until_ready(o) for o in outs]

    # Reference check: apply the same bf16 quantization to the conv inputs that
    # the kernel's MXU feed sees (accumulation is f32 on both sides), then
    # compare against XLA's conv at highest precision with a tight tolerance.
    w_q = weight.astype(jnp.bfloat16).astype(jnp.float32)
    for x, o in zip(x_parallel, outs):
        x_q = x.astype(jnp.bfloat16).astype(jnp.float32)
        ref = jax.lax.conv_general_dilated(
            x_q, w_q, window_strides=(1, 1), padding="SAME",
            dimension_numbers=("NCHW", "OIHW", "NCHW"),
            precision=jax.lax.Precision.HIGHEST)
        assert o.shape == (B, C_out, H, W)
        assert jnp.allclose(o, ref, atol=1e-3, rtol=1e-3)

    print("KERNEL_OK")
</pallas_src>

<mosaic_0001>
module attributes {stable_mosaic.version = 11 : i64} {
  func.func @_conv_gemm_kernel(%arg0: i32, %arg1: memref<256x36xbf16, #tpu.memory_space<vmem>>, %arg2: memref<36x128xbf16, #tpu.memory_space<vmem>>, %arg3: memref<256x128xf32, #tpu.memory_space<vmem>>) attributes {dimension_semantics = [#tpu.dimension_semantics<parallel>], iteration_bounds = array<i64: 4>, scalar_prefetch = 0 : i64, scratch_operands = 0 : i64, tpu.core_type = #tpu.core_type<tc>, window_params = [{transform_indices = @transform_0, window_bounds = array<i64: 256, 36>}, {pipeline_mode = #tpu.pipeline_mode<synchronous>, transform_indices = @transform_1, window_bounds = array<i64: 36, 128>}, {transform_indices = @transform_2, window_bounds = array<i64: 256, 128>}]} {
    %c0 = arith.constant 0 : index
    %c0_0 = arith.constant 0 : index
    %0 = vector.load %arg1[%c0, %c0_0] : memref<256x36xbf16, #tpu.memory_space<vmem>>, vector<256x36xbf16>
    %c0_1 = arith.constant 0 : index
    %c0_2 = arith.constant 0 : index
    %1 = vector.load %arg2[%c0_1, %c0_2] : memref<36x128xbf16, #tpu.memory_space<vmem>>, vector<36x128xbf16>
    %cst = arith.constant dense<0.000000e+00> : vector<256x128xf32>
    %2 = tpu.matmul %0, %1, %cst {dimension_numbers = #tpu.dot_dimension_numbers<[1], [0], [0], [1], [0, 0, 1, 1], [], []>} : vector<256x36xbf16>, vector<36x128xbf16>, vector<256x128xf32> -> vector<256x128xf32>
    %c0_3 = arith.constant 0 : index
    %c0_4 = arith.constant 0 : index
    %3 = vector.load %arg3[%c0_3, %c0_4] : memref<256x128xf32, #tpu.memory_space<vmem>>, vector<256x128xf32>
    tpu.vector_store %arg3[%c0_3, %c0_4], %2 {strides = array<i32>} : memref<256x128xf32, #tpu.memory_space<vmem>>, vector<256x128xf32>,
    return
  }
  func.func @transform_0(%arg0: i32) -> (i32, i32) {
    %c0_i32 = arith.constant 0 : i32
    %c0_i32_0 = arith.constant 0 : i32
    return %arg0, %c0_i32 : i32, i32
  }
  func.func @transform_1(%arg0: i32) -> (i32, i32) {
    %c0_i32 = arith.constant 0 : i32
    %c0_i32_0 = arith.constant 0 : i32
    %c0_i32_1 = arith.constant 0 : i32
    return %c0_i32, %c0_i32_0 : i32, i32
  }
  func.func @transform_2(%arg0: i32) -> (i32, i32) {
    %c0_i32 = arith.constant 0 : i32
    %c0_i32_0 = arith.constant 0 : i32
    return %arg0, %c0_i32 : i32, i32
  }
}

</mosaic_0001>

<bundles_post_ra>
// kernel: tpu_custom_call.1
= control target key start
LH: loop header
LB: loop body
LE: loop exit
PB: predicated region body
PF: predicated region fallthrough
CT: control target
= control target key end

     0   :  { %7 = vsyncpa [#allocation3], 0  ;;  %s1039_s0 = inlined_call_operand.vmem [shape: bf16[1024,36], index: 0, kind: input, shape index: {}]   ;;  %s1040_s1 = inlined_call_operand.vmem [shape: bf16[36,128], index: 1, kind: input, shape index: {}]   ;;  %s1041_s2 = inlined_call_operand.hbm [shape: f32[1024,128], index: 2, kind: output, shape index: {}]  }
   0x1   :  { %9 = vsyncpa [#allocation3 + $0x1], 0  ;;  %s855_s9 = smov 0   ;;  %s857_s10 = smov 0  }
   0x2   :  { %s859_s11 = smov 0   ;;  %s861_s12 = smov 0  }
   0x3 LB: > { %s876_s13 = sadd.s32 4294967295, %s835_s12   ;;  %s600_s14 = sadd.s32 4294967294, %s835_s12   ;;  %s835_s12 = sphi %s861_s12, %s1047_s12   ;;  %s831_s11 = sphi %s859_s11, %s1046_s11   ;;  %s827_s10 = sphi %s857_s10, %s1045_s10   ;;  %s823_s9 = sphi %s855_s9, %s1044_s9  }
   0x4   : > { %s880_s15 = sadd.s32 1, %s835_s12   ;;  %s69_s16 = sadd.s32 1, %s831_s11 }
   0x5   : > { %s66_s17 = ssub.s32 %s835_s12, %s880_s15  ;;  %p79_p0 = scmp.ne.s32.totalorder %s831_s11, %s827_s10 }
   0x6   : > { %p67_p1 = scmp.eq.s32.totalorder %s66_s17, 0  ;;  %p80_p2 = scmp.eq.s32.totalorder %s876_s13, 3 }
   0x7   : > { %p85_p3 = scmp.ne.s32.totalorder %s827_s10, %s823_s9  ;;  %p86_p4 = scmp.eq.s32.totalorder %s600_s14, 3 }
   0x8   : > { %s891_s18 = scalar_select %p67_p1, %s831_s11, %s69_s16  }
   0x9   : > { %p893_p5 = por %p80_p2, %p79_p0  ;;  %p897_p6 = por %p86_p4, %p85_p3 }
   0xa   : > { %p603_p7 = scmp.ge.s32.totalorder %s835_s12, 1  ;;  %p116_p8 = scmp.lt.s32.totalorder %s835_s12, 5 }
   0xc   : > { %p117_p9 = pnand %p603_p7, %p116_p8 }
   0xd   : > { %v754_v0 = vld [vmem:[%s1040_s1] sm:$0xff] (!%p117_p9)   ;;  %v755_v1 = vld [vmem:[%s1040_s1 + $0x8] sm:$0xff] (!%p117_p9)   ;;  %s605_s25 = sshll.u32 (!%p117_p9), %s876_s13, 5  ;;  %v756_v2 = vld [vmem:[%s1040_s1 + $0x10] ss:$0 sps:$4 sm:$0x33] (!%p117_p9)  }
   0xe   : > { %120 = sbr.rel (%p117_p9) target bundleno = 281 (0x119), region = 28  ;;  %667 = vmatprep.subr.bf16.mxu0 (!%p117_p9), %v754_v0  ;;  %705 = vmatprep.subr.bf16.mxu1 (!%p117_p9), %v754_v0  ;;  %p139_p10 = scmp.lt.s32.totalorder (!%p117_p9), %s605_s25, 127  ;;  %vm327_vm0 = vcmask (!%p117_p9), 1041408   ;;  %vm278_vm1 = vcmask (!%p117_p9), 293888  }
   0xf   : > { %668 = vmatpush3.bf16.msra.mxu0 (!%p117_p9), %v754_v0  ;;  %708 = vmatpush3.bf16.msra.mxu1 (!%p117_p9), %v754_v0  ;;  %v329_v3 = vsel (!%p117_p9), %vm327_vm0, %v756_v2, 0  ;;  %s135_s4 = sand.u32 (!%p117_p9), 1, %s827_s10   ;;  %s647_s7 = sshll.u32 (!%p117_p9), %s876_s13, 12 }
  0x10   : > { %669 = vmatprep.subr.bf16.mxu0 (!%p117_p9), %v755_v1  ;;  %706 = vmatprep.subr.bf16.mxu1 (!%p117_p9), %v755_v1  ;;  %s604_s5 = sshll.u32 (!%p117_p9), %s135_s4, 8  ;;  %s986_s17 = scalar_lea.hbm (!%p117_p9), %s1041_s2, %s647_s7 }
  0x11   : > { %s953_s6 = scalar_lea.vmem (!%p117_p9), [#allocation2], %s604_s5  ;;  %s998_s13 = scalar_lea.sflag (!%p117_p9), [#allocation3], %s135_s4 }
  0x12   : > { %s538_s8 = sshll.u32 (!%p117_p9), %s953_s6, 4  ;;  %s837_s22 = smov (!%p117_p9), [#allocation2]   ;;  %s988_s8 = int_to_ptr.vmem [resolvable:$true] %s538_s8 }
  0x13   : > { %670 = vmatpush3.bf16.msra.mxu0 (!%p117_p9), %v755_v1  ;;  %709 = vmatpush3.bf16.msra.mxu1 (!%p117_p9), %v755_v1  ;;  %s773_s21 = scalar_lea.vmem (!%p117_p9), %s988_s8, 4096  ;;  %s777_s23 = sshll.u32 (!%p117_p9), %s837_s22, 4  ;;  %s778_s23 = int_to_ptr.vmem [resolvable:$false] %s777_s23 }
  0x14   : > { %711 = vmatprep.subr.msk.bf16.mxu0 (!%p117_p9), %vm327_vm0, %v756_v2  ;;  %712 = vmatprep.subr.msk.bf16.mxu1 (!%p117_p9), %vm327_vm0, %v756_v2  ;;  %p774_p11 = scmp.ne.s32.totalorder (!%p117_p9), %s988_s8, %s773_s21  ;;  %s779_s24 = scalar_lea.vmem (!%p117_p9), %s778_s23, 8192 }
  0x15   : > { %s1049_s25 = smov (!%p139_p10, %s605_s25), 127  ;;  %p780_p0 = scmp.lt.s32.totalorder %s988_s8, %s778_s23 }
  0x16   : > { %s606_s28 = sshll.u32 %s1049_s25, 2  ;;  %p775_p12 = pnand %p774_p11, %p893_p5 }
  0x17   : > { %s916_s3 = scalar_lea.vmem %s1039_s0, %s606_s28  ;;  %672 = vmatpush3.bf16.msra.mxu0 %v329_v3  ;;  %710 = vmatpush3.bf16.msra.mxu1 %v329_v3  ;;  %p781_p1 = scmp.lt.s32.totalorder %s779_s24, %s773_s21 }
  0x18   : > { %v757_v4 = vld [vmem:[%s916_s3] sm:$0xff]   ;;  %v759_v6 = vld [vmem:[%s916_s3 + $0x8] sm:$0xff]   ;;  %v761_v8 = vld [vmem:[%s916_s3 + $0x10] sm:$0xff]   ;;  %p776_p13 = pneg %p775_p12 }
  0x19   : > { %v758_v5 = vld [vmem:[%s916_s3 + $0x40] sm:$0xff]   ;;  %673 = vmatprep.mubr.msk.bf16.mxu0 %vm278_vm1, %v757_v4  ;;  %v760_v7 = vld [vmem:[%s916_s3 + $0x48] sm:$0xff]   ;;  %v762_v9 = vld [vmem:[%s916_s3 + $0x50] sm:$0xff]   ;;  %p782_p2 = por %p781_p1, %p780_p0 }
  0x1a   : > { %689 = vmatprep.mubr.msk.bf16.mxu1 %vm278_vm1, %v758_v5  ;;  %674 = vmatmul.mubr.msk.bf16.vlgmr.msra.gmra.mrb[0].mxu0 %vm278_vm1, %v759_v6  ;;  %v763_v10 = vld [vmem:[%s916_s3 + $0x18] sm:$0xff]   ;;  %v765_v12 = vld [vmem:[%s916_s3 + $0x20] sm:$0xff]   ;;  %v767_v14 = vld [vmem:[%s916_s3 + $0x28] sm:$0xff]  }
  0x1b   : > { %690 = vmatmul.mubr.msk.bf16.vlgmr.msra.gmra.mrb[0].mxu1 %vm278_vm1, %v760_v7  ;;  %677 = vmatprep.mubr.msk.bf16.mxu0 %vm278_vm1, %v761_v8  ;;  %v764_v11 = vld [vmem:[%s916_s3 + $0x58] sm:$0xff]   ;;  %v766_v13 = vld [vmem:[%s916_s3 + $0x60] sm:$0xff]   ;;  %v768_v15 = vld [vmem:[%s916_s3 + $0x68] sm:$0xff]   ;;  %p783_p3 = pnand %p782_p2, %p776_p13 }
  0x1c   : > { %693 = vmatprep.mubr.msk.bf16.mxu1 %vm278_vm1, %v762_v9  ;;  %v769_v16 = vld [vmem:[%s916_s3 + $0x30] sm:$0xff]   ;;  %v771_v18 = vld [vmem:[%s916_s3 + $0x38] sm:$0xff]  }
  0x1d   : > { %v770_v17 = vld [vmem:[%s916_s3 + $0x70] sm:$0xff]   ;;  %v772_v19 = vld [vmem:[%s916_s3 + $0x78] sm:$0xff]  }
  0x22   : > { %678 = vmatmul.mubr.msk.bf16.gmra.mrb[4].mxu0 %vm278_vm1, %v763_v10 }
  0x23   : > { %694 = vmatmul.mubr.msk.bf16.gmra.mrb[4].mxu1 %vm278_vm1, %v764_v11  ;;  %681 = vmatprep.mubr.msk.bf16.mxu0 %vm278_vm1, %v765_v12 }
  0x24   : > { %697 = vmatprep.mubr.msk.bf16.mxu1 %vm278_vm1, %v766_v13 }
  0x2a   : > { %682 = vmatmul.mubr.msk.bf16.gmra.mrb[8].mxu0 %vm278_vm1, %v767_v14 }
  0x2b   : > { %698 = vmatmul.mubr.msk.bf16.gmra.mrb[8].mxu1 %vm278_vm1, %v768_v15  ;;  %685 = vmatprep.mubr.msk.bf16.mxu0 %vm278_vm1, %v769_v16 }
  0x2c   : > { %701 = vmatprep.mubr.msk.bf16.mxu1 %vm278_vm1, %v770_v17 }
  0x32   : > { %686 = vmatmul.mubr.msk.bf16.gmra.mrb[12].mxu0 %vm278_vm1, %v771_v18 }
  0x33   : > { %702 = vmatmul.mubr.msk.bf16.gmra.mrb[12].mxu1 %vm278_vm1, %v772_v19 }
  0xed   : > { %v675_v20 = vpop.f32.mrb[0].mxu0 }
  0xee   : > { %v691_v21 = vpop.f32.mrb[0].mxu1  ;;  %494 = vst [vmem:[%s953_s6 + $0x10] sm:$0xff] %v675_v20  ;;  %v365_v22 = vpop.f32.mrb[1].mxu0 }
  0xef   : > { %510 = vst [vmem:[%s953_s6 + $0x90] sm:$0xff] %v691_v21  ;;  %v429_v23 = vpop.f32.mrb[1].mxu1  ;;  %492 = vst [vmem:[%s953_s6] sm:$0xff] %v365_v22  ;;  %v676_v24 = vpop.f32.mrb[2].mxu0 }
  0xf0   : > { %508 = vst [vmem:[%s953_s6 + $0x80] sm:$0xff] %v429_v23  ;;  %v692_v25 = vpop.f32.mrb[2].mxu1  ;;  %495 = vst [vmem:[%s953_s6 + $0x18] sm:$0xff] %v676_v24  ;;  %v368_v26 = vpop.f32.mrb[3].mxu0 }
  0xf1   : > { %511 = vst [vmem:[%s953_s6 + $0x98] sm:$0xff] %v692_v25  ;;  %v432_v27 = vpop.f32.mrb[3].mxu1  ;;  %493 = vst [vmem:[%s953_s6 + $0x8] sm:$0xff] %v368_v26 }
  0xf2   : > { %509 = vst [vmem:[%s953_s6 + $0x88] sm:$0xff] %v432_v27 }
  0xf5   : > { %v679_v28 = vpop.f32.mrb[4].mxu0 }
  0xf6   : > { %v695_v29 = vpop.f32.mrb[4].mxu1  ;;  %498 = vst [vmem:[%s953_s6 + $0x30] sm:$0xff] %v679_v28  ;;  %v381_v30 = vpop.f32.mrb[5].mxu0 }
  0xf7   : > { %514 = vst [vmem:[%s953_s6 + $0xb0] sm:$0xff] %v695_v29  ;;  %v445_v31 = vpop.f32.mrb[5].mxu1  ;;  %496 = vst [vmem:[%s953_s6 + $0x20] sm:$0xff] %v381_v30  ;;  %v680_v32 = vpop.f32.mrb[6].mxu0 }
  0xf8   : > { %512 = vst [vmem:[%s953_s6 + $0xa0] sm:$0xff] %v445_v31  ;;  %v696_v33 = vpop.f32.mrb[6].mxu1  ;;  %499 = vst [vmem:[%s953_s6 + $0x38] sm:$0xff] %v680_v32  ;;  %v384_v34 = vpop.f32.mrb[7].mxu0 }
  0xf9   : > { %515 = vst [vmem:[%s953_s6 + $0xb8] sm:$0xff] %v696_v33  ;;  %v448_v35 = vpop.f32.mrb[7].mxu1  ;;  %497 = vst [vmem:[%s953_s6 + $0x28] sm:$0xff] %v384_v34 }
  0xfa   : > { %513 = vst [vmem:[%s953_s6 + $0xa8] sm:$0xff] %v448_v35 }
  0xfd   : > { %v683_v36 = vpop.f32.mrb[8].mxu0 }
  0xfe   : > { %v699_v37 = vpop.f32.mrb[8].mxu1  ;;  %502 = vst [vmem:[%s953_s6 + $0x50] sm:$0xff] %v683_v36  ;;  %v397_v38 = vpop.f32.mrb[9].mxu0 }
  0xff   : > { %518 = vst [vmem:[%s953_s6 + $0xd0] sm:$0xff] %v699_v37  ;;  %v461_v39 = vpop.f32.mrb[9].mxu1  ;;  %500 = vst [vmem:[%s953_s6 + $0x40] sm:$0xff] %v397_v38  ;;  %v684_v40 = vpop.f32.mrb[10].mxu0 }
 0x100   : > { %516 = vst [vmem:[%s953_s6 + $0xc0] sm:$0xff] %v461_v39  ;;  %v700_v41 = vpop.f32.mrb[10].mxu1  ;;  %503 = vst [vmem:[%s953_s6 + $0x58] sm:$0xff] %v684_v40  ;;  %v400_v42 = vpop.f32.mrb[11].mxu0 }
 0x101   : > { %519 = vst [vmem:[%s953_s6 + $0xd8] sm:$0xff] %v700_v41  ;;  %v464_v43 = vpop.f32.mrb[11].mxu1  ;;  %501 = vst [vmem:[%s953_s6 + $0x48] sm:$0xff] %v400_v42 }
 0x102   : > { %517 = vst [vmem:[%s953_s6 + $0xc8] sm:$0xff] %v464_v43 }
 0x105   : > { %v687_v44 = vpop.f32.mrb[12].mxu0 }
 0x106   : > { %v703_v45 = vpop.f32.mrb[12].mxu1  ;;  %506 = vst [vmem:[%s953_s6 + $0x70] sm:$0xff] %v687_v44  ;;  %v413_v46 = vpop.f32.mrb[13].mxu0 }
 0x107   : > { %522 = vst [vmem:[%s953_s6 + $0xf0] sm:$0xff] %v703_v45  ;;  %v477_v47 = vpop.f32.mrb[13].mxu1  ;;  %504 = vst [vmem:[%s953_s6 + $0x60] sm:$0xff] %v413_v46  ;;  %v688_v48 = vpop.f32.mrb[14].mxu0 }
 0x108   : > { %520 = vst [vmem:[%s953_s6 + $0xe0] sm:$0xff] %v477_v47  ;;  %v704_v49 = vpop.f32.mrb[14].mxu1  ;;  %507 = vst [vmem:[%s953_s6 + $0x78] sm:$0xff] %v688_v48  ;;  %v416_v50 = vpop.f32.mrb[15].mxu0 }
 0x109   : > { %523 = vst [vmem:[%s953_s6 + $0xf8] sm:$0xff] %v704_v49  ;;  %v480_v51 = vpop.f32.mrb[15].mxu1  ;;  %505 = vst [vmem:[%s953_s6 + $0x68] sm:$0xff] %v416_v50 }
 0x10a   : > { %521 = vst [vmem:[%s953_s6 + $0xe8] sm:$0xff] %v480_v51 }
 0x10b   : > { %786 = shalt.err (!%p783_p3)
}
 0x10c   : > { %s787_s25 = scalar_lea.hbm %s986_s17, 4096  ;;  %s791_s28 = scalar_lea.hbm %s1041_s2, 16384 }
 0x10d   : > { %p788_p4 = scmp.ne.s32.totalorder %s986_s17, %s787_s25  ;;  %p792_p9 = scmp.lt.u32.totalorder %s986_s17, %s1041_s2 }
 0x10e   : > { %p793_p10 = scmp.lt.u32.totalorder %s791_s28, %s787_s25  ;;  %p795_p12 = scmp.lt.u32.totalorder %s787_s25, %s986_s17 }
 0x10f   : > { %p789_p7 = pnand %p788_p4, %p893_p5 }
 0x110   : > { %p794_p11 = por %p793_p10, %p792_p9 }
 0x111   : > { %p790_p8 = pneg %p789_p7 }
 0x112   : > { %p796_p13 = por %p795_p12, %p794_p11 }
 0x114   : > { %p797_p0 = pnand %p796_p13, %p790_p8 }
 0x116   : > { %800 = shalt.err (!%p797_p0)
}
 0x117   : > { %s838_s3 = smov 128   ;;  %s839_s4 = smov 8  }
 0x118   : > { %713 = dma.vmem_to_hbm [thread:$0]  (%p893_p5), %s988_s8, 4096, %s986_s17, %s998_s13, %s838_s3, %s838_s3, %s839_s4  }
 0x119 PF: > { %p719_p1 = scmp.ge.s32.totalorder %s835_s12, 2  ;;  %s553_s5 = sand.u32 1, %s823_s9  }
 0x11a   : > { %s554_s6 = scalar_lea.sflag [#allocation3], %s553_s5 }
 0x11b   : > { %p716_p2 = pnand %p719_p1, %p897_p6 }
 0x11d   : > { %818 = dma.done.wait (!%p716_p2), %s554_s6, 4096  }
 0x11e   : > { %820 = vsyncadd (!%p716_p2), %s554_s6, 4294963200  ;;  %p12_p3 = scmp.ge.s32.totalorder %s880_s15, 6   ;;  %s1044_s9 = smov %s827_s10 }
 0x11f   : > { %s1045_s10 = smov %s831_s11  ;;  %s1046_s11 = smov %s891_s18 }
 0x120   : > { %s1047_s12 = smov %s880_s15  ;;  %14 = sbr.rel (!%p12_p3) target bundleno = 3 (0x3), region = 63 }
 0x127   :  { %559 = vsyncpa [#allocation3], 1 }
 0x128   :  { %561 = vsyncpa [#allocation3 + $0x1], 1 }

</bundles_post_ra>
